<compile_context>
chip_gen: v7x
topology: tpu7x:2x2x1
jax: 0.10.0
libtpu: 0.0.40
codegen_flags: <defaults>
</compile_context>

<pallas_src>
import functools

import jax
import jax.numpy as jnp
from jax.experimental import pallas as pl
from jax.experimental.pallas import tpu as pltpu

_HID1 = 64        # fc1 width in the PyTorch module
_HID1_PAD = 128   # fc1 width padded to one full lane register
_HID2 = 256       # fc_value / fc_adv width


def _qnet_kernel(x_ref, w1_ref, b1_ref, wbr_ref, bbr_ref, wq_ref, bq_ref, q_ref):
    x = x_ref[...]

    # fc1 (padded to 128 out) + ReLU -> (TB, 128) f32; padded cols stay 0.
    y = jnp.dot(x, w1_ref[...], preferred_element_type=jnp.float32) + b1_ref[...]
    y = jnp.maximum(y, 0.0)

    # Fused value|adv branches: (TB,128) @ (128,512), bf16 operands, f32 accumulate.
    #   z[:, :256] = relu(fc_value(y)),  z[:, 256:] = relu(fc_adv(y))
    z = jnp.dot(y.astype(jnp.bfloat16), wbr_ref[...],
                preferred_element_type=jnp.float32) + bbr_ref[...]
    z = jnp.maximum(z, 0.0)

    # Fused dueling head: wq/bq already encode the V broadcast and the
    # (A - mean A) centering, so the matmul output IS Q.
    q = jnp.dot(z.astype(jnp.bfloat16), wq_ref[...],
                preferred_element_type=jnp.float32) + bq_ref[...]
    q_ref[...] = q.astype(q_ref.dtype)


def _round_up(x, m):
    return ((x + m - 1) // m) * m


def _pick_tile(batch, tile_b):
    tb = max(8, min(_round_up(tile_b, 8), _round_up(batch, 8)))
    # v7x megacore: guarantee >= 2 grid steps for non-trivial batches so the
    # "parallel" batch axis can shard across both TensorCores.
    if batch >= 64 and _round_up(batch, tb) // tb < 2:
        tb = _round_up((_round_up(batch, 8) + 1) // 2, 8)
    return tb


@functools.partial(jax.jit, static_argnames=("tile_b",))
def qnetwork_forward(state, fused, tile_b=2048):
    """state: (B, n_state) f32; fused: output of fuse_params. Returns (B, n_action)."""
    B, n_state = state.shape
    n_action = fused["wq"].shape[1]

    tb = _pick_tile(B, tile_b)
    b_pad = _round_up(B, tb)
    if b_pad != B:
        state = jnp.pad(state, ((0, b_pad - B), (0, 0)))

    grid = (b_pad // tb,)

    def _resident(arr):
        # Full-array block, same tile every grid step -> VMEM-resident,
        # single-buffered (constant index_map => double-buffering is useless).
        return pl.BlockSpec(arr.shape, lambda i: (0, 0),
                            pipeline_mode=pl.Buffered(1))

    q = pl.pallas_call(
        _qnet_kernel,
        out_shape=jax.ShapeDtypeStruct((b_pad, n_action), jnp.float32),
        grid=grid,
        in_specs=[
            pl.BlockSpec((tb, n_state), lambda i: (i, 0)),   # activations: tiled over batch
            _resident(fused["w1"]), _resident(fused["b1"]),
            _resident(fused["wbr"]), _resident(fused["bbr"]),
            _resident(fused["wq"]), _resident(fused["bq"]),
        ],
        out_specs=pl.BlockSpec((tb, n_action), lambda i: (i, 0)),
        compiler_params=pltpu.CompilerParams(
            dimension_semantics=("parallel",),
            vmem_limit_bytes=32 * 1024 * 1024),
    )(state, fused["w1"], fused["b1"], fused["wbr"], fused["bbr"],
      fused["wq"], fused["bq"])

    if b_pad != B:
        q = q[:B]
    return q


def init_qnetwork_params(key, n_state, n_action):
    """torch.nn.Linear-style init: W, b ~ U(-1/sqrt(fan_in), 1/sqrt(fan_in)).
    Weights stored transposed vs. PyTorch, i.e. (in_features, out_features)."""
    def linear(k, fan_in, fan_out):
        kw, kb = jax.random.split(k)
        bound = 1.0 / jnp.sqrt(jnp.float32(fan_in))
        w = jax.random.uniform(kw, (fan_in, fan_out), jnp.float32, -bound, bound)
        b = jax.random.uniform(kb, (1, fan_out), jnp.float32, -bound, bound)
        return w, b

    k1, k2, k3, k4, k5 = jax.random.split(key, 5)
    w1, b1 = linear(k1, n_state, _HID1)        # fc1
    wv, bv = linear(k2, _HID1, _HID2)          # fc_value
    wa, ba = linear(k3, _HID1, _HID2)          # fc_adv
    wval, bval = linear(k4, _HID2, 1)          # value head
    wadv, badv = linear(k5, _HID2, n_action)   # adv head
    return {"w1": w1, "b1": b1, "wv": wv, "bv": bv, "wa": wa, "ba": ba,
            "wval": wval, "bval": bval, "wadv": wadv, "badv": badv}


def fuse_params(params, n_state, n_action):
    """Build the padded / fused / bf16 weights the kernel consumes (host side, once)."""
    # fc1 padded to 128 output lanes (kept f32: tiny K, and preserves input precision).
    w1 = jnp.zeros((n_state, _HID1_PAD), jnp.float32).at[:, :_HID1].set(params["w1"])
    b1 = jnp.zeros((1, _HID1_PAD), jnp.float32).at[:, :_HID1].set(params["b1"])

    # Fused value|adv branch weights (128, 512); padded fc1 rows are zero -> exact.
    wbr = (jnp.zeros((_HID1_PAD, 2 * _HID2), jnp.float32)
           .at[:_HID1, :_HID2].set(params["wv"])
           .at[:_HID1, _HID2:].set(params["wa"]))
    bbr = jnp.concatenate([params["bv"], params["ba"]], axis=1)

    # Fused dueling head (512, n_action): V broadcast + (A - mean A) centering folded in.
    wadv_c = params["wadv"] - jnp.mean(params["wadv"], axis=1, keepdims=True)
    wq = jnp.concatenate(
        [jnp.broadcast_to(params["wval"], (_HID2, n_action)), wadv_c], axis=0)
    bq = params["bval"] + params["badv"] - jnp.mean(params["badv"], axis=1, keepdims=True)

    return {"w1": w1, "b1": b1,
            "wbr": wbr.astype(jnp.bfloat16), "bbr": bbr,
            "wq": wq.astype(jnp.bfloat16), "bq": bq}


def qnetwork_reference(state, params):
    """Plain-JAX f32 reference (unfused, mirrors the PyTorch forward)."""
    y = jax.nn.relu(state @ params["w1"] + params["b1"])
    v = jax.nn.relu(y @ params["wv"] + params["bv"])
    a = jax.nn.relu(y @ params["wa"] + params["ba"])
    value = v @ params["wval"] + params["bval"]
    adv = a @ params["wadv"] + params["badv"]
    return value + adv - jnp.mean(adv, axis=1, keepdims=True)


if __name__ == "__main__":
    n_state = 8
    n_action = 4
    batch = 8

    key = jax.random.PRNGKey(0)
    k_params, k_state = jax.random.split(key)

    params = init_qnetwork_params(k_params, n_state, n_action)
    fused = fuse_params(params, n_state, n_action)
    state = jax.random.normal(k_state, (batch, n_state), jnp.float32)

    q = qnetwork_forward(state, fused)
    q = jax.block_until_ready(q)

    q_ref = qnetwork_reference(state, params)
    assert q.shape == (batch, n_action)
    # bf16 MXU operands (f32 accumulate) => small drift vs. the pure-f32 reference.
    assert jnp.allclose(q, q_ref, atol=5e-2, rtol=5e-2), "mismatch vs reference"

    print("KERNEL_OK")
</pallas_src>

<mosaic_0001>
module attributes {stable_mosaic.version = 11 : i64} {
  func.func @_qnet_kernel(%arg0: i32, %arg1: memref<8x8xf32, #tpu.memory_space<vmem>>, %arg2: memref<8x128xf32, #tpu.memory_space<vmem>>, %arg3: memref<1x128xf32, #tpu.memory_space<vmem>>, %arg4: memref<128x512xbf16, #tpu.memory_space<vmem>>, %arg5: memref<1x512xf32, #tpu.memory_space<vmem>>, %arg6: memref<512x4xbf16, #tpu.memory_space<vmem>>, %arg7: memref<1x4xf32, #tpu.memory_space<vmem>>, %arg8: memref<8x4xf32, #tpu.memory_space<vmem>>) attributes {dimension_semantics = [#tpu.dimension_semantics<parallel>], iteration_bounds = array<i64: 1>, scalar_prefetch = 0 : i64, scratch_operands = 0 : i64, tpu.core_type = #tpu.core_type<tc>, window_params = [{transform_indices = @transform_0, window_bounds = array<i64: 8, 8>}, {pipeline_mode = #tpu.pipeline_mode<synchronous>, transform_indices = @transform_1, window_bounds = array<i64: 8, 128>}, {pipeline_mode = #tpu.pipeline_mode<synchronous>, transform_indices = @transform_2, window_bounds = array<i64: 1, 128>}, {pipeline_mode = #tpu.pipeline_mode<synchronous>, transform_indices = @transform_3, window_bounds = array<i64: 128, 512>}, {pipeline_mode = #tpu.pipeline_mode<synchronous>, transform_indices = @transform_4, window_bounds = array<i64: 1, 512>}, {pipeline_mode = #tpu.pipeline_mode<synchronous>, transform_indices = @transform_5, window_bounds = array<i64: 512, 4>}, {pipeline_mode = #tpu.pipeline_mode<synchronous>, transform_indices = @transform_6, window_bounds = array<i64: 1, 4>}, {transform_indices = @transform_7, window_bounds = array<i64: 8, 4>}]} {
    %c0 = arith.constant 0 : index
    %c0_0 = arith.constant 0 : index
    %0 = vector.load %arg1[%c0, %c0_0] : memref<8x8xf32, #tpu.memory_space<vmem>>, vector<8x8xf32>
    %c0_1 = arith.constant 0 : index
    %c0_2 = arith.constant 0 : index
    %1 = vector.load %arg2[%c0_1, %c0_2] : memref<8x128xf32, #tpu.memory_space<vmem>>, vector<8x128xf32>
    %cst = arith.constant dense<0.000000e+00> : vector<8x128xf32>
    %2 = tpu.matmul %0, %1, %cst {dimension_numbers = #tpu.dot_dimension_numbers<[1], [0], [0], [1], [0, 0, 1, 1], [], []>} : vector<8x8xf32>, vector<8x128xf32>, vector<8x128xf32> -> vector<8x128xf32>
    %c0_3 = arith.constant 0 : index
    %c0_4 = arith.constant 0 : index
    %3 = vector.load %arg3[%c0_3, %c0_4] : memref<1x128xf32, #tpu.memory_space<vmem>>, vector<1x128xf32>
    %4 = vector.broadcast %3 : vector<1x128xf32> to vector<8x128xf32>
    %5 = arith.addf %2, %4 : vector<8x128xf32>
    %cst_5 = arith.constant 0.000000e+00 : f32
    %6 = vector.broadcast %cst_5 : f32 to vector<8x128xf32>
    %7 = arith.maximumf %5, %6 : vector<8x128xf32>
    %8 = arith.truncf %7 : vector<8x128xf32> to vector<8x128xbf16>
    %c0_6 = arith.constant 0 : index
    %c0_7 = arith.constant 0 : index
    %9 = vector.load %arg4[%c0_6, %c0_7] : memref<128x512xbf16, #tpu.memory_space<vmem>>, vector<128x512xbf16>
    %cst_8 = arith.constant dense<0.000000e+00> : vector<8x512xf32>
    %10 = tpu.matmul %8, %9, %cst_8 {dimension_numbers = #tpu.dot_dimension_numbers<[1], [0], [0], [1], [0, 0, 1, 1], [], []>} : vector<8x128xbf16>, vector<128x512xbf16>, vector<8x512xf32> -> vector<8x512xf32>
    %c0_9 = arith.constant 0 : index
    %c0_10 = arith.constant 0 : index
    %11 = vector.load %arg5[%c0_9, %c0_10] : memref<1x512xf32, #tpu.memory_space<vmem>>, vector<1x512xf32>
    %12 = vector.broadcast %11 : vector<1x512xf32> to vector<8x512xf32>
    %13 = arith.addf %10, %12 : vector<8x512xf32>
    %cst_11 = arith.constant 0.000000e+00 : f32
    %14 = vector.broadcast %cst_11 : f32 to vector<8x512xf32>
    %15 = arith.maximumf %13, %14 : vector<8x512xf32>
    %16 = arith.truncf %15 : vector<8x512xf32> to vector<8x512xbf16>
    %c0_12 = arith.constant 0 : index
    %c0_13 = arith.constant 0 : index
    %17 = vector.load %arg6[%c0_12, %c0_13] : memref<512x4xbf16, #tpu.memory_space<vmem>>, vector<512x4xbf16>
    %cst_14 = arith.constant dense<0.000000e+00> : vector<8x4xf32>
    %18 = tpu.matmul %16, %17, %cst_14 {dimension_numbers = #tpu.dot_dimension_numbers<[1], [0], [0], [1], [0, 0, 1, 1], [], []>} : vector<8x512xbf16>, vector<512x4xbf16>, vector<8x4xf32> -> vector<8x4xf32>
    %c0_15 = arith.constant 0 : index
    %c0_16 = arith.constant 0 : index
    %19 = vector.load %arg7[%c0_15, %c0_16] : memref<1x4xf32, #tpu.memory_space<vmem>>, vector<1x4xf32>
    %20 = vector.broadcast %19 : vector<1x4xf32> to vector<8x4xf32>
    %21 = arith.addf %18, %20 : vector<8x4xf32>
    %c0_17 = arith.constant 0 : index
    %c0_18 = arith.constant 0 : index
    %22 = vector.load %arg8[%c0_17, %c0_18] : memref<8x4xf32, #tpu.memory_space<vmem>>, vector<8x4xf32>
    tpu.vector_store %arg8[%c0_17, %c0_18], %21 {strides = array<i32>} : memref<8x4xf32, #tpu.memory_space<vmem>>, vector<8x4xf32>,
    return
  }
  func.func @transform_0(%arg0: i32) -> (i32, i32) {
    %c0_i32 = arith.constant 0 : i32
    %c0_i32_0 = arith.constant 0 : i32
    return %arg0, %c0_i32 : i32, i32
  }
  func.func @transform_1(%arg0: i32) -> (i32, i32) {
    %c0_i32 = arith.constant 0 : i32
    %c0_i32_0 = arith.constant 0 : i32
    %c0_i32_1 = arith.constant 0 : i32
    return %c0_i32, %c0_i32_0 : i32, i32
  }
  func.func @transform_2(%arg0: i32) -> (i32, i32) {
    %c0_i32 = arith.constant 0 : i32
    %c0_i32_0 = arith.constant 0 : i32
    %c0_i32_1 = arith.constant 0 : i32
    return %c0_i32, %c0_i32_0 : i32, i32
  }
  func.func @transform_3(%arg0: i32) -> (i32, i32) {
    %c0_i32 = arith.constant 0 : i32
    %c0_i32_0 = arith.constant 0 : i32
    %c0_i32_1 = arith.constant 0 : i32
    return %c0_i32, %c0_i32_0 : i32, i32
  }
  func.func @transform_4(%arg0: i32) -> (i32, i32) {
    %c0_i32 = arith.constant 0 : i32
    %c0_i32_0 = arith.constant 0 : i32
    %c0_i32_1 = arith.constant 0 : i32
    return %c0_i32, %c0_i32_0 : i32, i32
  }
  func.func @transform_5(%arg0: i32) -> (i32, i32) {
    %c0_i32 = arith.constant 0 : i32
    %c0_i32_0 = arith.constant 0 : i32
    %c0_i32_1 = arith.constant 0 : i32
    return %c0_i32, %c0_i32_0 : i32, i32
  }
  func.func @transform_6(%arg0: i32) -> (i32, i32) {
    %c0_i32 = arith.constant 0 : i32
    %c0_i32_0 = arith.constant 0 : i32
    %c0_i32_1 = arith.constant 0 : i32
    return %c0_i32, %c0_i32_0 : i32, i32
  }
  func.func @transform_7(%arg0: i32) -> (i32, i32) {
    %c0_i32 = arith.constant 0 : i32
    %c0_i32_0 = arith.constant 0 : i32
    return %arg0, %c0_i32 : i32, i32
  }
}

</mosaic_0001>

<bundles_post_ra>
// kernel: qnetwork_forward.1
= control target key start
LH: loop header
LB: loop body
LE: loop exit
PB: predicated region body
PF: predicated region fallthrough
CT: control target
= control target key end

     0   :  { %vm36_vm0 = vcmask 64512   ;;  %v966_v0 = vmov 0.0   ;;  %vm967_vm1 = vmmov 0   ;;  %v968_v35 = vmov 0   ;;  %s1219_s1 = inlined_call_operand.vmem [shape: f32[8,128], index: 1, kind: input, shape index: {}]   ;;  %s1220_s0 = inlined_call_operand.vmem [shape: f32[8,8], index: 0, kind: input, shape index: {}]   ;;  %s1221_s3 = inlined_call_operand.vmem [shape: bf16[128,512], index: 3, kind: input, shape index: {}]   ;;  %s1222_s5 = inlined_call_operand.vmem [shape: bf16[512,4], index: 5, kind: input, shape index: {}]   ;;  %s1223_s2 = inlined_call_operand.vmem [shape: f32[1,128], index: 2, kind: input, shape index: {}]   ;;  %s1224_s4 = inlined_call_operand.vmem [shape: f32[1,512], index: 4, kind: input, shape index: {}]   ;;  %s1225_s6 = inlined_call_operand.vmem [shape: f32[1,4], index: 6, kind: input, shape index: {}]   ;;  %s1226_s7 = inlined_call_operand.vmem [shape: f32[8,4], index: 7, kind: output, shape index: {}]  }
   0x1   :  { %878 = vmatprep.subr.mxu0 %v966_v0  ;;  %v28_v1 = vld [vmem:[%s1219_s1] sm:$0xff]  ;;  %880 = vmatprep.mubr.msk.f32.mxu0 %vm967_vm1, %v966_v0  ;;  %v888_v4 = vld [vmem:[%s1221_s3 + $0x8] ss:$16 sps:$4 sm:$0xff]   ;;  %v890_v5 = vld [vmem:[%s1221_s3 + $0xc] ss:$16 sps:$4 sm:$0xff]   ;;  %vm759_vm2 = vcmask 31744  }
   0x2   :  { %v27_v2 = vld [vmem:[%s1220_s0] sm:$0xff]  ;;  %879 = vmatpush3.msra.mxu0 %v28_v1  ;;  %v894_v8 = vld [vmem:[%s1221_s3 + $0x28] ss:$16 sps:$4 sm:$0xff]   ;;  %v896_v9 = vld [vmem:[%s1221_s3 + $0x2c] ss:$16 sps:$4 sm:$0xff]   ;;  %358 = vmatprep.mubr.bf16.mxu1 %v968_v35 }
   0x3   :  { %v886_v3 = vld [vmem:[%s1221_s3 + $0x4] ss:$16 sps:$4 sm:$0xff]   ;;  %881 = vmatmul.mubr.msk.f32.vlgmr.msra.gmra.mrb[0].mxu0 %vm36_vm0, %v27_v2  ;;  %v891_v6 = vld [vmem:[%s1221_s3] ss:$16 sps:$4 sm:$0xff]   ;;  %367 = vmatprep.subr.bf16.mxu0 %v890_v5  ;;  %v900_v12 = vld [vmem:[%s1221_s3 + $0x48] ss:$16 sps:$4 sm:$0xff]  }
   0x4   :  { %326 = vmatprep.subr.bf16.mxu1 %v886_v3  ;;  %v892_v7 = vld [vmem:[%s1221_s3 + $0x24] ss:$16 sps:$4 sm:$0xff]   ;;  %368 = vmatpush1.bf16.msra.mxu0 %v888_v4  ;;  %v897_v10 = vld [vmem:[%s1221_s3 + $0x20] ss:$16 sps:$4 sm:$0xff]   ;;  %v902_v13 = vld [vmem:[%s1221_s3 + $0x4c] ss:$16 sps:$4 sm:$0xff]  }
   0x5   :  { %327 = vmatpush1.bf16.msra.mxu1 %v891_v6  ;;  %v898_v11 = vld [vmem:[%s1221_s3 + $0x44] ss:$16 sps:$4 sm:$0xff]   ;;  %369 = vmatprep.subr.bf16.mxu0 %v896_v9  ;;  %v903_v14 = vld [vmem:[%s1221_s3 + $0x40] ss:$16 sps:$4 sm:$0xff]   ;;  %v908_v16 = vld [vmem:[%s1221_s3 + $0x6c] ss:$16 sps:$4 sm:$0xff]  }
   0x6   :  { %328 = vmatprep.subr.bf16.mxu1 %v892_v7  ;;  %v904_v15 = vld [vmem:[%s1221_s3 + $0x64] ss:$16 sps:$4 sm:$0xff]   ;;  %v906_v17 = vld [vmem:[%s1221_s3 + $0x68] ss:$16 sps:$4 sm:$0xff]   ;;  %v909_v18 = vld [vmem:[%s1221_s3 + $0x60] ss:$16 sps:$4 sm:$0xff]   ;;  %399 = vmatprep.mubr.bf16.mxu0 %v968_v35 }
   0x7   :  { %v910_v19 = vld [vmem:[%s1221_s3 + $0x84] ss:$16 sps:$4 sm:$0xff]   ;;  %v914_v20 = vld [vmem:[%s1221_s3 + $0x8c] ss:$16 sps:$4 sm:$0xff]   ;;  %v912_v21 = vld [vmem:[%s1221_s3 + $0x88] ss:$16 sps:$4 sm:$0xff]  }
   0x8   :  { %370 = vmatpush1.bf16.msra.mxu0 %v894_v8  ;;  %v915_v22 = vld [vmem:[%s1221_s3 + $0x80] ss:$16 sps:$4 sm:$0xff]   ;;  %v916_v23 = vld [vmem:[%s1221_s3 + $0xa4] ss:$16 sps:$4 sm:$0xff]   ;;  %v920_v24 = vld [vmem:[%s1221_s3 + $0xac] ss:$16 sps:$4 sm:$0xff]  }
   0x9   :  { %329 = vmatpush1.bf16.msra.mxu1 %v897_v10  ;;  %371 = vmatprep.subr.bf16.mxu0 %v902_v13  ;;  %v918_v25 = vld [vmem:[%s1221_s3 + $0xa8] ss:$16 sps:$4 sm:$0xff]   ;;  %v921_v26 = vld [vmem:[%s1221_s3 + $0xa0] ss:$16 sps:$4 sm:$0xff]   ;;  %v922_v27 = vld [vmem:[%s1221_s3 + $0xc4] ss:$16 sps:$4 sm:$0xff]   ;;  %v146_v10 = vlaneseq }
   0xa   :  { %330 = vmatprep.subr.bf16.mxu1 %v898_v11  ;;  %v926_v28 = vld [vmem:[%s1221_s3 + $0xcc] ss:$16 sps:$4 sm:$0xff]   ;;  %v924_v29 = vld [vmem:[%s1221_s3 + $0xc8] ss:$16 sps:$4 sm:$0xff]   ;;  %v927_v30 = vld [vmem:[%s1221_s3 + $0xc0] ss:$16 sps:$4 sm:$0xff]  }
   0xb   :  { %v928_v31 = vld [vmem:[%s1221_s3 + $0xe4] ss:$16 sps:$4 sm:$0xff]   ;;  %v932_v32 = vld [vmem:[%s1221_s3 + $0xec] ss:$16 sps:$4 sm:$0xff]   ;;  %v930_v33 = vld [vmem:[%s1221_s3 + $0xe8] ss:$16 sps:$4 sm:$0xff]  }
   0xc   :  { %372 = vmatpush1.bf16.msra.mxu0 %v900_v12  ;;  %v933_v34 = vld [vmem:[%s1221_s3 + $0xe0] ss:$16 sps:$4 sm:$0xff]   ;;  %v938_v46 = vld [vmem:[%s1222_s5 + $0x48] sm:$0xff]   ;;  %v946_v54 = vld [vmem:[%s1222_s5 + $0x58] sm:$0xff]   ;;  %v147_v11 = vshrl.u32 %v146_v10, 7 }
   0xd   :  { %331 = vmatpush1.bf16.msra.mxu1 %v903_v14  ;;  %373 = vmatprep.subr.bf16.mxu0 %v908_v16  ;;  %v934_v36 = vld [vmem:[%s1222_s5 + $0x40] sm:$0xff]   ;;  %v939_v47 = vld [vmem:[%s1222_s5 + $0xc8] sm:$0xff]   ;;  %v942_v50 = vld [vmem:[%s1222_s5 + $0x50] sm:$0xff]  }
   0xe   :  { %332 = vmatprep.subr.bf16.mxu1 %v904_v15  ;;  %v935_v37 = vld [vmem:[%s1222_s5 + $0xc0] sm:$0xff]   ;;  %v940_v48 = vld [vmem:[%s1222_s5 + $0x8] sm:$0xff]   ;;  %v943_v51 = vld [vmem:[%s1222_s5 + $0xd0] sm:$0xff]   ;;  %v148_v12 = vsub.s32 0, %v147_v11  ;;  %v156_v13 = vsub.s32 2, %v147_v11  ;;  %v152_v15 = vsub.s32 1, %v147_v11 }
   0xf   :  { %v765_v38 = vld [vmem:[%s1223_s2] ss:$0 sm:$0xff]  ;;  %v941_v49 = vld [vmem:[%s1222_s5 + $0x88] sm:$0xff]   ;;  %v944_v52 = vld [vmem:[%s1222_s5 + $0x10] sm:$0xff]   ;;  %v160_v16 = vsub.s32 3, %v147_v11 }
  0x10   :  { %374 = vmatpush1.bf16.msra.mxu0 %v906_v17  ;;  %v936_v43 = vld [vmem:[%s1222_s5] sm:$0xff]   ;;  %v945_v53 = vld [vmem:[%s1222_s5 + $0x90] sm:$0xff]   ;;  %v947_v55 = vld [vmem:[%s1222_s5 + $0xd8] sm:$0xff]  }
  0x11   :  { %333 = vmatpush1.bf16.msra.mxu1 %v909_v18  ;;  %375 = vmatprep.subr.bf16.mxu0 %v914_v20  ;;  %v937_v44 = vld [vmem:[%s1222_s5 + $0x80] sm:$0xff]   ;;  %v948_v56 = vld [vmem:[%s1222_s5 + $0x18] sm:$0xff]   ;;  %v954_v62 = vld [vmem:[%s1222_s5 + $0x68] sm:$0xff]  }
  0x12   :  { %334 = vmatprep.subr.bf16.mxu1 %v910_v19  ;;  %v949_v57 = vld [vmem:[%s1222_s5 + $0x98] sm:$0xff]   ;;  %v950_v58 = vld [vmem:[%s1222_s5 + $0x60] sm:$0xff]   ;;  %v955_v63 = vld [vmem:[%s1222_s5 + $0xe8] sm:$0xff]  }
  0x13   :  { %v951_v59 = vld [vmem:[%s1222_s5 + $0xe0] sm:$0xff]   ;;  %v956_v0 = vld [vmem:[%s1222_s5 + $0x28] sm:$0xff]   ;;  %v958_v2 = vld [vmem:[%s1222_s5 + $0x70] sm:$0xff]  }
  0x14   :  { %376 = vmatpush1.bf16.msra.mxu0 %v912_v21  ;;  %v952_v60 = vld [vmem:[%s1222_s5 + $0x20] sm:$0xff]   ;;  %v957_v1 = vld [vmem:[%s1222_s5 + $0xa8] sm:$0xff]   ;;  %v959_v3 = vld [vmem:[%s1222_s5 + $0xf0] sm:$0xff]  }
  0x15   :  { %335 = vmatpush1.bf16.msra.mxu1 %v915_v22  ;;  %377 = vmatprep.subr.bf16.mxu0 %v920_v24  ;;  %v953_v61 = vld [vmem:[%s1222_s5 + $0xa0] sm:$0xff]   ;;  %v960_v4 = vld [vmem:[%s1222_s5 + $0x30] sm:$0xff]   ;;  %v962_v6 = vld [vmem:[%s1222_s5 + $0x78] sm:$0xff]  }
  0x16   :  { %336 = vmatprep.subr.bf16.mxu1 %v916_v23  ;;  %v961_v5 = vld [vmem:[%s1222_s5 + $0xb0] sm:$0xff]   ;;  %v963_v7 = vld [vmem:[%s1222_s5 + $0xf8] sm:$0xff]   ;;  %v144_v14 = vld [vmem:[%s1224_s4] sm:$0xf] }
  0x17   :  { %v964_v8 = vld [vmem:[%s1222_s5 + $0x38] sm:$0xff]   ;;  %v149_v17 = vrot.slane %v144_v14, %v148_v12  ;;  %v157_v18 = vrot.slane %v144_v14, %v156_v13  ;;  %v153_v19 = vrot.slane %v144_v14, %v152_v15  ;;  %v161_v20 = vrot.slane %v144_v14, %v160_v16 }
  0x18   :  { %378 = vmatpush1.bf16.msra.mxu0 %v918_v25  ;;  %v965_v9 = vld [vmem:[%s1222_s5 + $0xb8] sm:$0xff]  }
  0x19   :  { %337 = vmatpush1.bf16.msra.mxu1 %v921_v26  ;;  %379 = vmatprep.subr.bf16.mxu0 %v926_v28 }
  0x1a   :  { %338 = vmatprep.subr.bf16.mxu1 %v922_v27 }
  0x1c   :  { %380 = vmatpush1.bf16.msra.mxu0 %v924_v29 }
  0x1d   :  { %339 = vmatpush1.bf16.msra.mxu1 %v927_v30  ;;  %381 = vmatprep.subr.bf16.mxu0 %v932_v32 }
  0x1e   :  { %340 = vmatprep.subr.bf16.mxu1 %v928_v31 }
  0x20   :  { %382 = vmatpush1.bf16.msra.mxu0 %v930_v33 }
  0x21   :  { %341 = vmatpush1.bf16.msra.mxu1 %v933_v34  ;;  %856 = vmatprep.subr.bf16.mxu0 %v935_v37 }
  0x22   :  { %834 = vmatprep.subr.bf16.mxu1 %v934_v36 }
  0xd6   :  { %v106_v39 = vpop.f32.mrb[0].mxu0 }
  0xd7   :  { %v107_v40 = vadd.f32 %v765_v38, %v106_v39  ;;  %v882_v41 = vpop.f32.mrb[1].mxu0 }
  0xd9   :  { %v110_v42 = vmax.f32 %v107_v40, 0.0 }
  0xdb   :  { %v111_v45 = vpack.c.bf16 %v110_v42, %v110_v42 }
  0xdd   :  { %359 = vmatmul.mubr.bf16.vlgmr.msra.gmra.mrb[0].mxu1 %v111_v45  ;;  %400 = vmatmul.mubr.bf16.vlgmr.msra.gmra.mrb[4].mxu0 %v111_v45 }
  0xde   :  { %835 = vmatpush3.bf16.msra.mxu1 %v936_v43  ;;  %857 = vmatpush3.bf16.msra.mxu0 %v937_v44  ;;  %v799_v43 = vld [vmem:[%s1225_s6] ss:$0 sm:$0xff] }
  0xdf   :  { %836 = vmatprep.subr.bf16.mxu1 %v938_v46  ;;  %858 = vmatprep.subr.bf16.mxu0 %v939_v47 }
  0xe2   :  { %837 = vmatpush3.bf16.msra.mxu1 %v940_v48  ;;  %859 = vmatpush3.bf16.msra.mxu0 %v941_v49 }
  0xe3   :  { %838 = vmatprep.subr.bf16.mxu1 %v942_v50  ;;  %860 = vmatprep.subr.bf16.mxu0 %v943_v51 }
  0xe6   :  { %839 = vmatpush3.bf16.msra.mxu1 %v944_v52  ;;  %861 = vmatpush3.bf16.msra.mxu0 %v945_v53 }
  0xe7   :  { %840 = vmatprep.subr.bf16.mxu1 %v946_v54  ;;  %862 = vmatprep.subr.bf16.mxu0 %v947_v55 }
  0xea   :  { %841 = vmatpush3.bf16.msra.mxu1 %v948_v56  ;;  %863 = vmatpush3.bf16.msra.mxu0 %v949_v57 }
  0xeb   :  { %842 = vmatprep.subr.bf16.mxu1 %v950_v58  ;;  %864 = vmatprep.subr.bf16.mxu0 %v951_v59 }
  0xee   :  { %843 = vmatpush3.bf16.msra.mxu1 %v952_v60  ;;  %865 = vmatpush3.bf16.msra.mxu0 %v953_v61 }
  0xef   :  { %844 = vmatprep.subr.bf16.mxu1 %v954_v62  ;;  %866 = vmatprep.subr.bf16.mxu0 %v955_v63 }
  0xf2   :  { %845 = vmatpush3.bf16.msra.mxu1 %v956_v0  ;;  %867 = vmatpush3.bf16.msra.mxu0 %v957_v1 }
  0xf3   :  { %846 = vmatprep.subr.bf16.mxu1 %v958_v2  ;;  %868 = vmatprep.subr.bf16.mxu0 %v959_v3 }
  0xf6   :  { %847 = vmatpush3.bf16.msra.mxu1 %v960_v4  ;;  %869 = vmatpush3.bf16.msra.mxu0 %v961_v5 }
  0xf7   :  { %848 = vmatprep.subr.bf16.mxu1 %v962_v6  ;;  %870 = vmatprep.subr.bf16.mxu0 %v963_v7 }
  0xfa   :  { %849 = vmatpush3.bf16.msra.mxu1 %v964_v8  ;;  %871 = vmatpush3.bf16.msra.mxu0 %v965_v9 }
 0x1b0   :  { %v360_v21 = vpop.f32.mrb[0].mxu1  ;;  %v401_v22 = vpop.f32.mrb[4].mxu0 }
 0x1b1   :  { %v361_v23 = vadd.f32 %v360_v21, %v149_v17  ;;  %v402_v24 = vadd.f32 %v401_v22, %v157_v18  ;;  %v362_v25 = vpop.f32.mrb[1].mxu1  ;;  %v403_v26 = vpop.f32.mrb[5].mxu0 }
 0x1b2   :  { %v363_v27 = vadd.f32 %v362_v25, %v153_v19  ;;  %v404_v28 = vadd.f32 %v403_v26, %v161_v20  ;;  %v364_v29 = vpop.f32.mrb[2].mxu1  ;;  %v405_v30 = vpop.f32.mrb[6].mxu0 }
 0x1b3   :  { %v408_v31 = vmax.f32 %v361_v23, 0.0  ;;  %v410_v32 = vmax.f32 %v402_v24, 0.0  ;;  %v365_v33 = vpop.f32.mrb[3].mxu1  ;;  %v406_v34 = vpop.f32.mrb[7].mxu0 }
 0x1b4   :  { %v409_v35 = vmax.f32 %v363_v27, 0.0  ;;  %v411_v36 = vmax.f32 %v404_v28, 0.0 }
 0x1b5   :  { %v412_v39 = vpack.c.bf16 %v408_v31, %v408_v31  ;;  %v414_v40 = vpack.c.bf16 %v410_v32, %v410_v32 }
 0x1b6   :  { %v413_v37 = vpack.c.bf16 %v409_v35, %v409_v35  ;;  %v415_v38 = vpack.c.bf16 %v411_v36, %v411_v36 }
 0x1b8   :  { %711 = vmatprep.mubr.bf16.mxu1 %v413_v37  ;;  %751 = vmatprep.mubr.bf16.mxu0 %v415_v38 }
 0x1b9   :  { %712 = vmatmul.mubr.bf16.vlgmr.msra.gmra.mrb[4].mxu1 %v412_v39  ;;  %752 = vmatmul.mubr.bf16.vlgmr.msra.gmra.mrb[8].mxu0 %v414_v40 }
 0x28c   :  { %v850_v41 = vpop.f32.mrb[4].mxu1  ;;  %v872_v42 = vpop.f32.mrb[8].mxu0 }
 0x28d   :  { %v851_v44 = vpop.f32.mrb[5].mxu1  ;;  %v873_v45 = vpop.f32.mrb[9].mxu0 }
 0x28e   :  { %v852_v46 = vadd.f32 %v851_v44, %v850_v41  ;;  %v874_v47 = vadd.f32 %v873_v45, %v872_v42  ;;  %v853_v48 = vpop.f32.mrb[6].mxu1  ;;  %v875_v49 = vpop.f32.mrb[10].mxu0 }
 0x28f   :  { %v854_v50 = vpop.f32.mrb[7].mxu1  ;;  %v876_v51 = vpop.f32.mrb[11].mxu0 }
 0x290   :  { %v714_v52 = vadd.f32 %v852_v46, %v799_v43 }
 0x292   :  { %v754_v53 = vadd.f32 %v874_v47, %v714_v52 }
 0x294   :  { %760 = vst.msk [vmem:[%s1226_s7] sm:$0xff] %vm759_vm2, %v754_v53 }

</bundles_post_ra>
